<compile_context>
chip_gen: v7x
topology: tpu7x:2x2x1
jax: 0.10.0
libtpu: 0.0.40
codegen_flags: <defaults>
</compile_context>

<pallas_src>
from functools import partial

import jax
import jax.numpy as jnp
import numpy as np
from jax.experimental import pallas as pl
from jax.experimental.pallas import tpu as pltpu


def mha_kernel(q_ref, k_ref, wq_ref, bq_ref, wk_ref, bk_ref, wc_ref, out_ref):
    """One batch-block per grid step.

    q_ref:  [Bt, C_q]        (bf16)
    k_ref:  [Bt*T_k, C_k]    (bf16, batch*time flattened -> one big matmul)
    wq_ref: [C_q, H] (bf16)  bq_ref: [1, H] (f32)
    wk_ref: [C_k, H] (bf16)  bk_ref: [1, H] (f32)
    wc_ref: [1, H]   (f32)   fused head-select * 1/sqrt(d) * linear_out weight
    out_ref:[Bt, T_k] (f32)  dense softmax rows over T_k
    """
    Bt, T_k = out_ref.shape
    H = wq_ref.shape[1]

    # linear_Q + ReLU -> [Bt, H]  (f32 accumulate, f32 bias/ReLU)
    q_l = jnp.maximum(
        jnp.dot(q_ref[...], wq_ref[...], preferred_element_type=jnp.float32)
        + bq_ref[...], 0.0)
    # linear_K + ReLU on the whole [Bt*T_k, C_k] slab in ONE MXU matmul.
    k_l = jnp.maximum(
        jnp.dot(k_ref[...], wk_ref[...], preferred_element_type=jnp.float32)
        + bk_ref[...], 0.0)                                   # [Bt*T_k, H]

    # Fused (per-head dot, 1/sqrt(d), linear_out weight):  v[b, :] = q_l * wc.
    v = q_l * wc_ref[...]                                     # [Bt, H]
    # logits[b, t] = <k_l[b, t, :], v[b, :]> : VPU multiply + lane reduce over
    # H (keeps the tiny per-example contraction off the MXU).
    logits = jnp.sum(k_l.reshape(Bt, T_k, H) * v[:, None, :], axis=-1)

    # Softmax over T_k (lane reduction); exact normalization.
    m = jnp.max(logits, axis=-1, keepdims=True)
    e = jnp.exp(logits - m)
    out_ref[...] = e / jnp.sum(e, axis=-1, keepdims=True)


def prepare_params(params, *, hidden_dim, num_heads):
    """One-time layout / fusion of torch-convention weights (off the per-call
    path).  MXU operands are pre-cast to bf16; VPU-side params stay f32."""
    wq, bq, wk, bk, wo, bo = params
    del bo  # scalar output bias is a no-op under softmax over T_k
    d = hidden_dim // num_heads
    scale = 1.0 / float(np.sqrt(d))
    # w_comb[j] = wo[0, j // d] * scale   -> [1, H]
    w_comb = (jnp.repeat(jnp.asarray(wo, jnp.float32).reshape(num_heads), d)
              * scale).reshape(1, hidden_dim)
    return (
        jnp.asarray(wq, jnp.float32).T.astype(jnp.bfloat16),   # [C_q, H]
        jnp.asarray(bq, jnp.float32).reshape(1, hidden_dim),   # [1, H]
        jnp.asarray(wk, jnp.float32).T.astype(jnp.bfloat16),   # [C_k, H]
        jnp.asarray(bk, jnp.float32).reshape(1, hidden_dim),   # [1, H]
        w_comb,                                                # [1, H] f32
    )


@partial(jax.jit, static_argnames=("block_b",))
def multihead_attention_batched(Q, K, kparams, *, block_b=None):
    """Q: [B, 1, C_q] (or [B, C_q]),  K: [B, T_k, C_k]  ->  [B, T_k] (f32)."""
    wq_t, bq2, wk_t, bk2, w_comb = kparams
    if Q.ndim == 3:
        Q = Q.reshape(Q.shape[0], Q.shape[-1])
    B, C_q = Q.shape
    _, T_k, C_k = K.shape
    H = wq_t.shape[1]

    # Batch-block size: default collapses the whole batch into one grid step.
    # For large B pass block_b (multiple of 8) to keep >=2 parallel steps
    # (v7x megacore) while each block still feeds a >=128-row K matmul.
    Bt = B if block_b is None else min(int(block_b), B)
    if Bt < B and Bt % 8 != 0:
        Bt = B  # keep sublane-aligned blocks; fall back to a single step
    n_blocks = -(-B // Bt)
    B_pad = n_blocks * Bt
    if B_pad != B:
        Q = jnp.pad(Q, ((0, B_pad - B), (0, 0)))
        K = jnp.pad(K, ((0, B_pad - B), (0, 0), (0, 0)))

    # bf16 MXU inputs; K pre-flattened (free XLA reshape) so the kernel runs
    # one [Bt*T_k, C_k] matmul per step.
    Qb = Q.astype(jnp.bfloat16)
    Kb = K.reshape(B_pad * T_k, C_k).astype(jnp.bfloat16)

    const2 = lambda b: (0, 0)   # weights: same block every step -> resident
    out = pl.pallas_call(
        mha_kernel,
        out_shape=jax.ShapeDtypeStruct((B_pad, T_k), jnp.float32),
        grid_spec=pl.GridSpec(
            grid=(n_blocks,),
            in_specs=[
                pl.BlockSpec((Bt, C_q), lambda b: (b, 0)),
                pl.BlockSpec((Bt * T_k, C_k), lambda b: (b, 0)),
                pl.BlockSpec((C_q, H), const2),
                pl.BlockSpec((1, H), const2),
                pl.BlockSpec((C_k, H), const2),
                pl.BlockSpec((1, H), const2),
                pl.BlockSpec((1, H), const2),
            ],
            out_specs=pl.BlockSpec((Bt, T_k), lambda b: (b, 0)),
        ),
        compiler_params=pltpu.CompilerParams(
            dimension_semantics=("parallel",),
            # Footprint here is tiny; explicit cap documents the budget and is
            # safe on v7x's 64 MiB physical VMEM.
            vmem_limit_bytes=32 * 1024 * 1024),
    )(Qb, Kb, wq_t, bq2, wk_t, bk2, w_comb)
    return out[:B]


def multihead_attention(Q, K, kparams):
    """Original torch-module API: Q [1, C_q], K [T_k, C_k] -> [T_k, 1]."""
    out = multihead_attention_batched(Q[None], K[None], kparams)   # [1, T_k]
    return out.reshape(-1, 1)


def reference_forward_single(Q, K, params, *, hidden_dim, num_heads):
    """Pure-JAX transcription of the torch forward (T_q == 1), incl. bo."""
    wq, bq, wk, bk, wo, bo = params
    d = hidden_dim // num_heads
    q_l = jax.nn.relu(Q @ wq.T + bq)            # [1, H]
    k_l = jax.nn.relu(K @ wk.T + bk)            # [T_k, H]
    heads = []
    for h in range(num_heads):
        qh = q_l[:, h * d:(h + 1) * d]          # [1, d]
        kh = k_l[:, h * d:(h + 1) * d]          # [T_k, d]
        heads.append((qh @ kh.T) / np.sqrt(d))  # [1, T_k]
    scores = jnp.concatenate(heads, axis=0).T   # [T_k, num_heads]
    logits = scores @ wo.T + bo                 # [T_k, 1]
    return jax.nn.softmax(logits, axis=0)       # [T_k, 1]


if __name__ == "__main__":
    hidden_dim = 32
    num_heads = 4
    C_q = C_k = hidden_dim
    T_k = 16
    B = 8

    key = jax.random.PRNGKey(0)
    ks = jax.random.split(key, 10)
    Q = jax.random.normal(ks[0], (B, 1, C_q), dtype=jnp.float32)
    K = jax.random.normal(ks[1], (B, T_k, C_k), dtype=jnp.float32)
    # Deterministic synthetic parameters (torch Linear shapes: weight [out, in]).
    wq = 0.1 * jax.random.normal(ks[2], (hidden_dim, C_q), dtype=jnp.float32)
    bq = 0.1 * jax.random.normal(ks[3], (hidden_dim,), dtype=jnp.float32)
    wk = 0.1 * jax.random.normal(ks[4], (hidden_dim, C_k), dtype=jnp.float32)
    bk = 0.1 * jax.random.normal(ks[5], (hidden_dim,), dtype=jnp.float32)
    wo = 0.1 * jax.random.normal(ks[6], (1, num_heads), dtype=jnp.float32)
    bo = 0.1 * jax.random.normal(ks[7], (1,), dtype=jnp.float32)
    params = (wq, bq, wk, bk, wo, bo)

    # One-time weight preparation (off the per-call path).
    kparams = prepare_params(params, hidden_dim=hidden_dim, num_heads=num_heads)

    ref_fn = jax.vmap(
        lambda q, k: reference_forward_single(
            q, k, params, hidden_dim=hidden_dim, num_heads=num_heads)[:, 0])

    # Tolerances absorb the bf16 MXU-input cast (projections accumulate f32).
    RTOL, ATOL = 1e-2, 5e-4

    # 1) Batched path: whole batch in ONE grid step, dense [B, T_k] output.
    out_b = jax.block_until_ready(multihead_attention_batched(Q, K, kparams))
    np.testing.assert_allclose(np.asarray(out_b), np.asarray(ref_fn(Q, K)),
                               rtol=RTOL, atol=ATOL)
    assert out_b.shape == (B, T_k)
    # Softmax rows normalize exactly (no approx reciprocal).
    np.testing.assert_allclose(np.asarray(out_b).sum(-1), np.ones(B), rtol=1e-5)

    # 2) Larger batch split into 2 "parallel" grid steps (v7x-style 2-TC grid).
    B2 = 16
    Q2 = jax.random.normal(ks[8], (B2, 1, C_q), dtype=jnp.float32)
    K2 = jax.random.normal(ks[9], (B2, T_k, C_k), dtype=jnp.float32)
    out_b2 = jax.block_until_ready(
        multihead_attention_batched(Q2, K2, kparams, block_b=8))
    np.testing.assert_allclose(np.asarray(out_b2), np.asarray(ref_fn(Q2, K2)),
                               rtol=RTOL, atol=ATOL)
    assert out_b2.shape == (B2, T_k)

    # 3) Single-example path with the original module's output shape [T_k, 1].
    out_1 = jax.block_until_ready(multihead_attention(Q[0], K[0], kparams))
    ref_1 = reference_forward_single(Q[0], K[0], params,
                                     hidden_dim=hidden_dim, num_heads=num_heads)
    np.testing.assert_allclose(np.asarray(out_1), np.asarray(ref_1),
                               rtol=RTOL, atol=ATOL)
    assert out_1.shape == (T_k, 1)

    print("KERNEL_OK")
</pallas_src>

<mosaic_0001>
module attributes {stable_mosaic.version = 11 : i64} {
  func.func @mha_kernel(%arg0: i32, %arg1: memref<8x32xbf16, #tpu.memory_space<vmem>>, %arg2: memref<128x32xbf16, #tpu.memory_space<vmem>>, %arg3: memref<32x32xbf16, #tpu.memory_space<vmem>>, %arg4: memref<1x32xf32, #tpu.memory_space<vmem>>, %arg5: memref<32x32xbf16, #tpu.memory_space<vmem>>, %arg6: memref<1x32xf32, #tpu.memory_space<vmem>>, %arg7: memref<1x32xf32, #tpu.memory_space<vmem>>, %arg8: memref<8x16xf32, #tpu.memory_space<vmem>>) attributes {dimension_semantics = [#tpu.dimension_semantics<parallel>], iteration_bounds = array<i64: 1>, scalar_prefetch = 0 : i64, scratch_operands = 0 : i64, tpu.core_type = #tpu.core_type<tc>, window_params = [{transform_indices = @transform_0, window_bounds = array<i64: 8, 32>}, {transform_indices = @transform_1, window_bounds = array<i64: 128, 32>}, {pipeline_mode = #tpu.pipeline_mode<synchronous>, transform_indices = @transform_2, window_bounds = array<i64: 32, 32>}, {pipeline_mode = #tpu.pipeline_mode<synchronous>, transform_indices = @transform_3, window_bounds = array<i64: 1, 32>}, {pipeline_mode = #tpu.pipeline_mode<synchronous>, transform_indices = @transform_4, window_bounds = array<i64: 32, 32>}, {pipeline_mode = #tpu.pipeline_mode<synchronous>, transform_indices = @transform_5, window_bounds = array<i64: 1, 32>}, {pipeline_mode = #tpu.pipeline_mode<synchronous>, transform_indices = @transform_6, window_bounds = array<i64: 1, 32>}, {transform_indices = @transform_7, window_bounds = array<i64: 8, 16>}]} {
    %c0 = arith.constant 0 : index
    %c0_0 = arith.constant 0 : index
    %0 = vector.load %arg1[%c0, %c0_0] : memref<8x32xbf16, #tpu.memory_space<vmem>>, vector<8x32xbf16>
    %c0_1 = arith.constant 0 : index
    %c0_2 = arith.constant 0 : index
    %1 = vector.load %arg3[%c0_1, %c0_2] : memref<32x32xbf16, #tpu.memory_space<vmem>>, vector<32x32xbf16>
    %cst = arith.constant dense<0.000000e+00> : vector<8x32xf32>
    %2 = tpu.matmul %0, %1, %cst {dimension_numbers = #tpu.dot_dimension_numbers<[1], [0], [0], [1], [0, 0, 1, 1], [], []>} : vector<8x32xbf16>, vector<32x32xbf16>, vector<8x32xf32> -> vector<8x32xf32>
    %c0_3 = arith.constant 0 : index
    %c0_4 = arith.constant 0 : index
    %3 = vector.load %arg4[%c0_3, %c0_4] : memref<1x32xf32, #tpu.memory_space<vmem>>, vector<1x32xf32>
    %4 = vector.broadcast %3 : vector<1x32xf32> to vector<8x32xf32>
    %5 = arith.addf %2, %4 : vector<8x32xf32>
    %cst_5 = arith.constant 0.000000e+00 : f32
    %6 = vector.broadcast %cst_5 : f32 to vector<8x32xf32>
    %7 = arith.maximumf %5, %6 : vector<8x32xf32>
    %c0_6 = arith.constant 0 : index
    %c0_7 = arith.constant 0 : index
    %8 = vector.load %arg2[%c0_6, %c0_7] : memref<128x32xbf16, #tpu.memory_space<vmem>>, vector<128x32xbf16>
    %c0_8 = arith.constant 0 : index
    %c0_9 = arith.constant 0 : index
    %9 = vector.load %arg5[%c0_8, %c0_9] : memref<32x32xbf16, #tpu.memory_space<vmem>>, vector<32x32xbf16>
    %cst_10 = arith.constant dense<0.000000e+00> : vector<128x32xf32>
    %10 = tpu.matmul %8, %9, %cst_10 {dimension_numbers = #tpu.dot_dimension_numbers<[1], [0], [0], [1], [0, 0, 1, 1], [], []>} : vector<128x32xbf16>, vector<32x32xbf16>, vector<128x32xf32> -> vector<128x32xf32>
    %c0_11 = arith.constant 0 : index
    %c0_12 = arith.constant 0 : index
    %11 = vector.load %arg6[%c0_11, %c0_12] : memref<1x32xf32, #tpu.memory_space<vmem>>, vector<1x32xf32>
    %12 = vector.broadcast %11 : vector<1x32xf32> to vector<128x32xf32>
    %13 = arith.addf %10, %12 : vector<128x32xf32>
    %cst_13 = arith.constant 0.000000e+00 : f32
    %14 = vector.broadcast %cst_13 : f32 to vector<128x32xf32>
    %15 = arith.maximumf %13, %14 : vector<128x32xf32>
    %c0_14 = arith.constant 0 : index
    %c0_15 = arith.constant 0 : index
    %16 = vector.load %arg7[%c0_14, %c0_15] : memref<1x32xf32, #tpu.memory_space<vmem>>, vector<1x32xf32>
    %17 = vector.broadcast %16 : vector<1x32xf32> to vector<8x32xf32>
    %18 = arith.mulf %7, %17 : vector<8x32xf32>
    %19 = vector.shape_cast %15 : vector<128x32xf32> to vector<8x16x32xf32>
    %20 = vector.shape_cast %18 : vector<8x32xf32> to vector<8x1x32xf32>
    %21 = vector.broadcast %20 : vector<8x1x32xf32> to vector<8x16x32xf32>
    %22 = arith.mulf %19, %21 : vector<8x16x32xf32>
    %cst_16 = arith.constant dense<0.000000e+00> : vector<8x16xf32>
    %23 = vector.multi_reduction <add>, %22, %cst_16 [2] : vector<8x16x32xf32> to vector<8x16xf32>
    %cst_17 = arith.constant dense<0xFF800000> : vector<8xf32>
    %24 = vector.multi_reduction <maximumf>, %23, %cst_17 [1] : vector<8x16xf32> to vector<8xf32>
    %25 = vector.shape_cast %24 : vector<8xf32> to vector<8x1xf32>
    %26 = vector.broadcast %25 : vector<8x1xf32> to vector<8x16xf32>
    %27 = arith.subf %23, %26 : vector<8x16xf32>
    %28 = math.exp %27 : vector<8x16xf32>
    %cst_18 = arith.constant dense<0.000000e+00> : vector<8xf32>
    %29 = vector.multi_reduction <add>, %28, %cst_18 [1] : vector<8x16xf32> to vector<8xf32>
    %30 = vector.shape_cast %29 : vector<8xf32> to vector<8x1xf32>
    %31 = vector.broadcast %30 : vector<8x1xf32> to vector<8x16xf32>
    %32 = arith.divf %28, %31 : vector<8x16xf32>
    %c0_19 = arith.constant 0 : index
    %c0_20 = arith.constant 0 : index
    %33 = vector.load %arg8[%c0_19, %c0_20] : memref<8x16xf32, #tpu.memory_space<vmem>>, vector<8x16xf32>
    tpu.vector_store %arg8[%c0_19, %c0_20], %32 {strides = array<i32>} : memref<8x16xf32, #tpu.memory_space<vmem>>, vector<8x16xf32>,
    return
  }
  func.func @transform_0(%arg0: i32) -> (i32, i32) {
    %c0_i32 = arith.constant 0 : i32
    %c0_i32_0 = arith.constant 0 : i32
    return %arg0, %c0_i32 : i32, i32
  }
  func.func @transform_1(%arg0: i32) -> (i32, i32) {
    %c0_i32 = arith.constant 0 : i32
    %c0_i32_0 = arith.constant 0 : i32
    return %arg0, %c0_i32 : i32, i32
  }
  func.func @transform_2(%arg0: i32) -> (i32, i32) {
    %c0_i32 = arith.constant 0 : i32
    %c0_i32_0 = arith.constant 0 : i32
    %c0_i32_1 = arith.constant 0 : i32
    return %c0_i32, %c0_i32_0 : i32, i32
  }
  func.func @transform_3(%arg0: i32) -> (i32, i32) {
    %c0_i32 = arith.constant 0 : i32
    %c0_i32_0 = arith.constant 0 : i32
    %c0_i32_1 = arith.constant 0 : i32
    return %c0_i32, %c0_i32_0 : i32, i32
  }
  func.func @transform_4(%arg0: i32) -> (i32, i32) {
    %c0_i32 = arith.constant 0 : i32
    %c0_i32_0 = arith.constant 0 : i32
    %c0_i32_1 = arith.constant 0 : i32
    return %c0_i32, %c0_i32_0 : i32, i32
  }
  func.func @transform_5(%arg0: i32) -> (i32, i32) {
    %c0_i32 = arith.constant 0 : i32
    %c0_i32_0 = arith.constant 0 : i32
    %c0_i32_1 = arith.constant 0 : i32
    return %c0_i32, %c0_i32_0 : i32, i32
  }
  func.func @transform_6(%arg0: i32) -> (i32, i32) {
    %c0_i32 = arith.constant 0 : i32
    %c0_i32_0 = arith.constant 0 : i32
    %c0_i32_1 = arith.constant 0 : i32
    return %c0_i32, %c0_i32_0 : i32, i32
  }
  func.func @transform_7(%arg0: i32) -> (i32, i32) {
    %c0_i32 = arith.constant 0 : i32
    %c0_i32_0 = arith.constant 0 : i32
    return %arg0, %c0_i32 : i32, i32
  }
}

</mosaic_0001>

<bundles_post_ra>
// kernel: multihead_attention_batched.1
= control target key start
LH: loop header
LB: loop body
LE: loop exit
PB: predicated region body
PF: predicated region fallthrough
CT: control target
= control target key end

     0   :  { %v1206_v1 = vmov 0.0   ;;  %vm1207_vm0 = vmmov 0   ;;  %vm52_vm1 = vcmask 261120   ;;  %s1653_s0 = inlined_call_operand.vmem [shape: bf16[8,32], index: 0, kind: input, shape index: {}]   ;;  %s1654_s1 = inlined_call_operand.vmem [shape: bf16[128,32], index: 1, kind: input, shape index: {}]   ;;  %s1655_s2 = inlined_call_operand.vmem [shape: bf16[32,32], index: 2, kind: input, shape index: {}]   ;;  %s1656_s3 = inlined_call_operand.vmem [shape: f32[1,32], index: 3, kind: input, shape index: {}]   ;;  %s1657_s4 = inlined_call_operand.vmem [shape: bf16[32,32], index: 4, kind: input, shape index: {}]   ;;  %s1658_s5 = inlined_call_operand.vmem [shape: f32[1,32], index: 5, kind: input, shape index: {}]   ;;  %s1659_s6 = inlined_call_operand.vmem [shape: f32[1,32], index: 6, kind: input, shape index: {}]   ;;  %s1660_s7 = inlined_call_operand.hbm [shape: f32[8,16], index: 7, kind: output, shape index: {}]  }
   0x1   :  { %v1122_v0 = vld [vmem:[%s1655_s2] sm:$0xff]   ;;  %1083 = vmatprep.subr.bf16.mxu0 %v1206_v1  ;;  %v1124_v3 = vld [vmem:[%s1655_s2 + $0x8] sm:$0xff]   ;;  %1087 = vmatprep.mubr.msk.bf16.mxu0 %vm1207_vm0, %v1206_v1  ;;  %v1126_v6 = vld [vmem:[%s1654_s1 + $0x10] sm:$0xff]  }
   0x2   :  { %v1123_v2 = vld [vmem:[%s1657_s4] sm:$0xff]   ;;  %1084 = vmatpush3.bf16.msra.mxu0 %v1122_v0  ;;  %v1125_v4 = vld [vmem:[%s1657_s4 + $0x8] sm:$0xff]   ;;  %v1127_v7 = vld [vmem:[%s1654_s1 + $0x18] sm:$0xff]   ;;  %1099 = vmatprep.mubr.msk.bf16.mxu1 %vm52_vm1, %v1126_v6 }
   0x3   :  { %1111 = vmatprep.subr.bf16.mxu1 %v1123_v2  ;;  %1085 = vmatprep.subr.bf16.mxu0 %v1206_v1  ;;  %v28_v5 = vld [vmem:[%s1653_s0] sm:$0xf] }
   0x4   :  { %1113 = vmatpush3.bf16.msra.mxu1 %v1123_v2  ;;  %v1128_v8 = vld [vmem:[%s1654_s1] sm:$0xff]  }
   0x5   :  { %1112 = vmatprep.subr.bf16.mxu1 %v1125_v4  ;;  %v1130_v9 = vld [vmem:[%s1654_s1 + $0x20] sm:$0xff]  }
   0x6   :  { %1086 = vmatpush3.bf16.msra.mxu0 %v1124_v3 }
   0x7   :  { %1091 = vmatprep.subr.bf16.mxu0 %v1123_v2 }
   0x8   :  { %1114 = vmatpush3.bf16.msra.mxu1 %v1125_v4 }
   0x9   :  { %1088 = vmatmul.mubr.msk.bf16.vlgmr.msra.gmra.mrb[0].mxu0 %vm52_vm1, %v28_v5 }
   0xa   :  { %1092 = vmatpush3.bf16.msra.mxu0 %v1123_v2  ;;  %1095 = vmatprep.mubr.msk.bf16.mxu0 %vm52_vm1, %v1128_v8 }
   0xb   :  { %1100 = vmatmul.mubr.msk.bf16.vlgmr.msra.gmra.mrb[0].mxu1 %vm52_vm1, %v1127_v7  ;;  %1093 = vmatprep.subr.bf16.mxu0 %v1125_v4 }
   0xc   :  { %1103 = vmatprep.mubr.msk.bf16.mxu1 %vm52_vm1, %v1130_v9 }
   0xd   :  { %12 = vsyncpa [#allocation3], 0  ;;  %v1129_v10 = vld [vmem:[%s1654_s1 + $0x8] sm:$0xff]   ;;  %v1132_v12 = vld [vmem:[%s1654_s1 + $0x30] sm:$0xff]   ;;  %v1208_v14 = vmov 1966171168   ;;  %v326_v16 = vlaneseq }
   0xe   :  { %1094 = vmatpush3.bf16.msra.mxu0 %v1125_v4  ;;  %v1131_v11 = vld [vmem:[%s1654_s1 + $0x28] sm:$0xff]   ;;  %v1133_v13 = vld [vmem:[%s1654_s1 + $0x38] sm:$0xff]   ;;  %v324_v15 = vunpack.c.l.s4 %v1208_v14  ;;  %v1046_v17 = vld [vmem:[%s1656_s3] ss:$0 sm:$0xff]  ;;  %vm502_vm2 = vcmask 130112   ;;  %vm567_vm3 = vcmask 1041409  }
   0xf   :  { %v1303_v19 = vshrl.u32 %v326_v16, 7  ;;  %v1069_v23 = vld [vmem:[%s1659_s6] ss:$0 sm:$0xff]  ;;  %vm569_vm4 = vcmask 1042434   ;;  %vm571_vm5 = vcmask 1043459   ;;  %vm573_vm6 = vcmask 1044484  }
  0x10   :  { %v325_v18 = vunpack.c.0.s8 %v324_v15  ;;  %v1314_v33 = vld [vmem:[%s1658_s5] ss:$0 sm:$0xff]  ;;  %vm575_vm7 = vcmask 1045509   ;;  %vm577_vm8 = vcmask 1046534   ;;  %vm579_vm9 = vcmask 1047559   ;;  %s1210_s5 = smov [#allocation2]  }
  0x11   :  { %1096 = vmatmul.mubr.msk.bf16.vlgmr.msra.gmra.mrb[4].mxu0 %vm52_vm1, %v1129_v10  ;;  %v1318_v36 = vsub.s32 0, %v1303_v19  ;;  %vm582_vm10 = vcmask 130048   ;;  %s1038_s6 = sshll.u32 %s1210_s5, 4  ;;  %s1039_s6 = int_to_ptr.vmem [resolvable:$true] %s1038_s6 }
  0x12   :  { %v1309_v27 = vsub.s32 %v325_v18, %v1303_v19  ;;  %s1182_s28 = scalar_lea.vmem %s1039_s6, 128  ;;  %p1187_p1 = scmp.lt.s32.totalorder %s1039_s6, %s1039_s6 }
  0x13   :  { %1104 = vmatmul.mubr.msk.bf16.gmra.mrb[4].mxu1 %vm52_vm1, %v1131_v11  ;;  %p1183_p0 = scmp.ne.s32.totalorder %s1039_s6, %s1182_s28  ;;  %p1188_p2 = scmp.lt.s32.totalorder %s1182_s28, %s1182_s28 }
  0x14   :  { %1107 = vmatprep.mubr.msk.bf16.mxu1 %vm52_vm1, %v1132_v12 }
  0x15   :  { %p1189_p3 = por %p1188_p2, %p1187_p1 }
  0x17   :  { %p1190_p4 = pnand %p1189_p3, %p1183_p0 }
  0x1b   :  { %1108 = vmatmul.mubr.msk.bf16.gmra.mrb[8].mxu1 %vm52_vm1, %v1133_v13 }
  0xdc   :  { %v90_v20 = vpop.f32.mrb[0].mxu0 }
  0xdd   :  { %v91_v21 = vadd.f32 %v1046_v17, %v90_v20  ;;  %v1089_v22 = vpop.f32.mrb[1].mxu0 }
  0xde   :  { %v93_v24 = vpop.f32.mrb[2].mxu0  ;;  %v1101_v25 = vpop.f32.mrb[0].mxu1 }
  0xdf   :  { %v96_v26 = vmax.f32 %v91_v21, 0.0  ;;  %v1090_v28 = vpop.f32.mrb[3].mxu0  ;;  %v250_v29 = vpop.f32.mrb[1].mxu1  ;;  %v259_v43 = vadd.f32 %v1101_v25, %v1314_v33 }
  0xe0   :  { %v1102_v30 = vpop.f32.mrb[2].mxu1  ;;  %v251_v39 = vadd.f32 %v1314_v33, %v250_v29 }
  0xe1   :  { %v320_v31 = vmul.f32 %v1069_v23, %v96_v26  ;;  %v253_v32 = vpop.f32.mrb[3].mxu1  ;;  %v262_v49 = vadd.f32 %v1102_v30, %v1314_v33  ;;  %v303_v17 = vmax.f32 %v259_v43, 0.0 }
  0xe2   :  { %v254_v44 = vadd.f32 %v1314_v33, %v253_v32  ;;  %v301_v59 = vmax.f32 %v251_v39, 0.0 }
  0xe3   :  { %v322_v34 = vcombine.high %v320_v31, %v320_v31  ;;  %v329_v35 = vrot.slane %v320_v31, %v1309_v27  ;;  %v304_v18 = vmax.f32 %v262_v49, 0.0 }
  0xe4   :  { %v1097_v37 = vpop.f32.mrb[4].mxu0  ;;  %v302_v0 = vmax.f32 %v254_v44, 0.0 }
  0xe5   :  { %v337_v38 = vcombine.high %v329_v35, %v329_v35  ;;  %v243_v40 = vadd.f32 %v1097_v37, %v1314_v33  ;;  %v234_v41 = vpop.f32.mrb[5].mxu0  ;;  %v345_v42 = vrot.slane %v329_v35, %v1309_v27  ;;  %v336_v48 = vrot.slane %v322_v34, %v1309_v27 }
  0xe6   :  { %v235_v45 = vadd.f32 %v1314_v33, %v234_v41  ;;  %v1105_v46 = vpop.f32.mrb[4].mxu1  ;;  %v1098_v47 = vpop.f32.mrb[6].mxu0 }
  0xe7   :  { %v246_v50 = vadd.f32 %v1098_v47, %v1314_v33  ;;  %v266_v51 = vpop.f32.mrb[5].mxu1  ;;  %v237_v52 = vpop.f32.mrb[7].mxu0  ;;  %v374_v53 = vrot.slane %v345_v42, %v1318_v36  ;;  %v359_v58 = vrot.slane %v337_v38, %v1309_v27  ;;  %v299_v60 = vmax.f32 %v243_v40, 0.0 }
  0xe8   :  { %v297_v54 = vmax.f32 %v235_v45, 0.0  ;;  %v267_v55 = vadd.f32 %v1314_v33, %v266_v51  ;;  %v238_v56 = vadd.f32 %v1314_v33, %v237_v52  ;;  %v1106_v57 = vpop.f32.mrb[6].mxu1  ;;  %v367_v63 = vcombine.high %v345_v42, %v345_v42 }
  0xe9   :  { %v300_v61 = vmax.f32 %v246_v50, 0.0  ;;  %v269_v62 = vpop.f32.mrb[7].mxu1  ;;  %v378_v5 = vrot.slane %v359_v58, %v1318_v36  ;;  %v352_v7 = vrot.slane %v336_v48, %v1309_v27  ;;  %v369_v11 = vcombine.high %v359_v58, %v359_v58 }
  0xea   :  { %v298_v1 = vmax.f32 %v238_v56, 0.0  ;;  %v270_v2 = vadd.f32 %v1314_v33, %v269_v62  ;;  %v411_v3 = vmul.f32 %v374_v53, %v297_v54  ;;  %v305_v4 = vmax.f32 %v267_v55, 0.0 }
  0xeb   :  { %v382_v6 = vrot.slane %v367_v63, %v1318_v36  ;;  %v413_v12 = vmul.f32 %v378_v5, %v299_v60  ;;  %v414_v14 = vmul.f32 %v378_v5, %v300_v61  ;;  %v390_v15 = vrot.slane %v352_v7, %v1318_v36 }
  0xec   :  { %v306_v8 = vmax.f32 %v270_v2, 0.0  ;;  %v427_v9 = vsel %vm52_vm1, %v411_v3, 0.0  ;;  %v412_v10 = vmul.f32 %v374_v53, %v298_v1  ;;  %v386_v22 = vrot.slane %v369_v11, %v1318_v36 }
  0xed   :  { %428 = vadd.xlane.f32.xlu0 %v427_v9  ;;  %v415_v13 = vmul.f32 %v382_v6, %v301_v59  ;;  %v416_v21 = vmul.f32 %v382_v6, %v302_v0  ;;  %v275_v23 = vadd.f32 %v1105_v46, %v1314_v33  ;;  %v278_v24 = vadd.f32 %v1106_v57, %v1314_v33 }
  0xee   :  { %v1109_v20 = vpop.f32.mrb[8].mxu1  ;;  %v433_v26 = vsel %vm52_vm1, %v413_v12, 0.0  ;;  %v338_v28 = vcombine.high %v336_v48, %v336_v48  ;;  %v419_v32 = vmul.f32 %v390_v15, %v305_v4  ;;  %v418_v34 = vmul.f32 %v386_v22, %v304_v18 }
  0xef   :  { %v282_v25 = vpop.f32.mrb[9].mxu1  ;;  %434 = vadd.xlane.f32.xlu1 %v433_v26  ;;  %v439_v31 = vsel %vm52_vm1, %v415_v13, 0.0  ;;  %v291_v35 = vadd.f32 %v1109_v20, %v1314_v33  ;;  %v417_v39 = vmul.f32 %v386_v22, %v303_v17  ;;  %v420_v40 = vmul.f32 %v390_v15, %v306_v8 }
  0xf0   :  { %v283_v29 = vadd.f32 %v1314_v33, %v282_v25  ;;  %v1110_v30 = vpop.f32.mrb[10].mxu1  ;;  %v307_v42 = vmax.f32 %v275_v23, 0.0  ;;  %v308_v43 = vmax.f32 %v278_v24, 0.0  ;;  %v436_v44 = vsel %vm52_vm1, %v414_v14, 0.0 }
  0xf1   :  { %v294_v37 = vadd.f32 %v1110_v30, %v1314_v33  ;;  %v285_v38 = vpop.f32.mrb[11].mxu1  ;;  %440 = vadd.xlane.f32.xlu0 %v439_v31  ;;  %v366_v45 = vrot.slane %v338_v28, %v1309_v27  ;;  %v451_v48 = vsel %vm52_vm1, %v419_v32, 0.0  ;;  %v368_v49 = vcombine.high %v352_v7, %v352_v7 }
  0xf2   :  { %v286_v41 = vadd.f32 %v1314_v33, %v285_v38  ;;  %v309_v46 = vmax.f32 %v283_v29, 0.0  ;;  %v311_v50 = vmax.f32 %v291_v35, 0.0  ;;  %v442_v54 = vsel %vm52_vm1, %v416_v21, 0.0 }
  0xf3   :  { %437 = vadd.xlane.f32.xlu1 %v436_v44  ;;  %v312_v51 = vmax.f32 %v294_v37, 0.0  ;;  %v394_v52 = vrot.slane %v366_v45, %v1318_v36  ;;  %v370_v53 = vcombine.high %v366_v45, %v366_v45  ;;  %v398_v33 = vrot.slane %v368_v49, %v1318_v36 }
  0xf4   :  { %v310_v47 = vmax.f32 %v286_v41, 0.0  ;;  %v430_v57 = vsel %vm52_vm1, %v412_v10, 0.0  ;;  %v448_v62 = vsel %vm52_vm1, %v418_v34, 0.0  ;;  %v445_v63 = vsel %vm52_vm1, %v417_v39, 0.0 }
  0xf5   :  { %452 = vadd.xlane.f32.xlu0 %v451_v48  ;;  %v421_v55 = vmul.f32 %v394_v52, %v307_v42  ;;  %v422_v56 = vmul.f32 %v394_v52, %v308_v43  ;;  %v402_v27 = vrot.slane %v370_v53, %v1318_v36  ;;  %v423_v58 = vmul.f32 %v398_v33, %v309_v46 }
  0xf6   :  { %v424_v59 = vmul.f32 %v398_v33, %v310_v47  ;;  %v454_v0 = vsel %vm52_vm1, %v420_v40, 0.0  ;;  %v492_v12 = vand.u32 127, %v326_v16 }
  0xf7   :  { %443 = vadd.xlane.f32.xlu1 %v442_v54  ;;  %v425_v60 = vmul.f32 %v402_v27, %v311_v50  ;;  %v426_v61 = vmul.f32 %v402_v27, %v312_v51  ;;  %v457_v1 = vsel %vm52_vm1, %v421_v55, 0.0  ;;  %v460_v2 = vsel %vm52_vm1, %v422_v56, 0.0 }
  0xf8   :  { %v463_v3 = vsel %vm52_vm1, %v423_v58, 0.0  ;;  %v466_v4 = vsel %vm52_vm1, %v424_v59, 0.0  ;;  %v497_v14 = vadd.s32 4294967288, %v492_v12  ;;  %v1383_v18 = vsub.s32 %v492_v12, %v1303_v19 }
  0xf9   :  { %431 = vadd.xlane.f32.xlu0 %v430_v57  ;;  %v469_v5 = vsel %vm52_vm1, %v425_v60, 0.0  ;;  %v472_v6 = vsel %vm52_vm1, %v426_v61, 0.0  ;;  %v1209_v61 = vmov 0   ;;  %v613_v12 = vsub.s32 6, %v1303_v19 }
  0xfa   :  { %v1386_v20 = vsub.s32 %v497_v14, %v1303_v19  ;;  %1121 = vset.pattern.permute.xlu0 %v1209_v61  ;;  %1120 = vset.pattern.permute.xlu1 %v1209_v61 }
  0xfb   :  { %449 = vadd.xlane.f32.xlu1 %v448_v62  ;;  %v593_v62 = vsub.s32 1, %v1303_v19 }
  0xfd   :  { %446 = vadd.xlane.f32.xlu0 %v445_v63 }
  0xff   :  { %455 = vadd.xlane.f32.xlu1 %v454_v0 }
 0x101   :  { %458 = vadd.xlane.f32.xlu0 %v457_v1 }
 0x103   :  { %461 = vadd.xlane.f32.xlu1 %v460_v2  ;;  %v609_v2 = vsub.s32 5, %v1303_v19 }
 0x105   :  { %464 = vadd.xlane.f32.xlu0 %v463_v3 }
 0x107   :  { %467 = vadd.xlane.f32.xlu1 %v466_v4 }
 0x109   :  { %470 = vadd.xlane.f32.xlu0 %v469_v5  ;;  %v597_v5 = vsub.s32 2, %v1303_v19 }
 0x10b   :  { %473 = vadd.xlane.f32.xlu1 %v472_v6 }
 0x17a   :  { %v1365_v7 = vpop.xlane.xlu0 %428 }
 0x17b   :  { %v496_v16 = vrot.slane %v1365_v7, %v1383_v18 }
 0x17c   :  { %v1367_v8 = vpop.xlane.xlu1 %434 }
 0x17d   :  { %v507_v26 = vrot.slane %v1367_v8, %v1383_v18 }
 0x17e   :  { %v1369_v9 = vpop.xlane.xlu0 %440 }
 0x17f   :  { %v516_v37 = vrot.slane %v1369_v9, %v1383_v18 }
 0x180   :  { %v1371_v10 = vpop.xlane.xlu1 %437 }
 0x181   :  { %v511_v24 = vrot.slane %v1371_v10, %v1386_v20 }
 0x182   :  { %v1373_v11 = vpop.xlane.xlu0 %452 }
 0x183   :  { %v512_v32 = vsel %vm502_vm2, %v511_v24, %v507_v26  ;;  %v534_v43 = vrot.slane %v1373_v11, %v1383_v18 }
 0x184   :  { %v1376_v13 = vpop.xlane.xlu1 %443 }
 0x185   :  { %v520_v30 = vrot.slane %v1376_v13, %v1386_v20 }
 0x186   :  { %v1378_v15 = vpop.xlane.xlu0 %431 }
 0x187   :  { %v501_v22 = vrot.slane %v1378_v15, %v1386_v20  ;;  %v521_v44 = vsel %vm502_vm2, %v520_v30, %v516_v37 }
 0x188   :  { %v1380_v17 = vpop.xlane.xlu1 %449 }
 0x189   :  { %v503_v28 = vsel %vm502_vm2, %v501_v22, %v496_v16  ;;  %v529_v34 = vrot.slane %v1380_v17, %v1386_v20 }
 0x18a   :  { %v1388_v21 = vpop.xlane.xlu0 %446  ;;  %v568_v38 = vsel %vm567_vm3, %v512_v32, %v503_v28 }
 0x18b   :  { %v525_v29 = vrot.slane %v1388_v21, %v1383_v18  ;;  %v570_v47 = vsel %vm569_vm4, %v521_v44, %v568_v38 }
 0x18c   :  { %v1392_v23 = vpop.xlane.xlu1 %455 }
 0x18d   :  { %v538_v39 = vrot.slane %v1392_v23, %v1386_v20  ;;  %v530_v40 = vsel %vm502_vm2, %v529_v34, %v525_v29  ;;  %v601_v29 = vsub.s32 3, %v1303_v19 }
 0x18e   :  { %v1398_v25 = vpop.xlane.xlu0 %458  ;;  %v572_v50 = vsel %vm571_vm5, %v530_v40, %v570_v47 }
 0x18f   :  { %v543_v41 = vrot.slane %v1398_v25, %v1383_v18  ;;  %v539_v51 = vsel %vm502_vm2, %v538_v39, %v534_v43 }
 0x190   :  { %v1407_v31 = vpop.xlane.xlu1 %461  ;;  %v574_v56 = vsel %vm573_vm6, %v539_v51, %v572_v50 }
 0x191   :  { %v547_v42 = vrot.slane %v1407_v31, %v1386_v20 }
 0x192   :  { %v1412_v35 = vpop.xlane.xlu0 %464 }
 0x193   :  { %v552_v45 = vrot.slane %v1412_v35, %v1383_v18  ;;  %v548_v52 = vsel %vm502_vm2, %v547_v42, %v543_v41 }
 0x194   :  { %v1429_v46 = vpop.xlane.xlu1 %467  ;;  %v576_v27 = vsel %vm575_vm7, %v548_v52, %v574_v56 }
 0x195   :  { %v556_v48 = vrot.slane %v1429_v46, %v1386_v20 }
 0x196   :  { %v1434_v49 = vpop.xlane.xlu0 %470 }
 0x197   :  { %v561_v53 = vrot.slane %v1434_v49, %v1383_v18  ;;  %v557_v54 = vsel %vm502_vm2, %v556_v48, %v552_v45 }
 0x198   :  { %v1441_v33 = vpop.xlane.xlu1 %473  ;;  %v578_v58 = vsel %vm577_vm8, %v557_v54, %v576_v27 }
 0x199   :  { %v565_v55 = vrot.slane %v1441_v33, %v1386_v20 }
 0x19b   :  { %v566_v57 = vsel %vm502_vm2, %v565_v55, %v561_v53 }
 0x19c   :  { %v580_v59 = vsel %vm579_vm9, %v566_v57, %v578_v58 }
 0x19d   :  { %v583_v60 = vsel %vm582_vm10, %v580_v59, -inf }
 0x19e   :  { %584 = vmax.xlane.f32.xlu0 %v583_v60 }
 0x22b   :  { %v585_v63 = vpop.xlane.xlu0 %584 }
 0x22c   :  { %v590_v0 = vrot.slane %v585_v63, %v1318_v36  ;;  %v594_v1 = vrot.slane %v585_v63, %v593_v62  ;;  %v1464_v14 = vrot.slane %v585_v63, %v609_v2  ;;  %v598_v24 = vrot.slane %v585_v63, %v597_v5 }
 0x22d   :  { %v602_v38 = vrot.slane %v585_v63, %v601_v29 }
 0x22e   :  { %v627_v3 = vsub.f32 %v1365_v7, %v590_v0  ;;  %v628_v4 = vsub.f32 %v1378_v15, %v590_v0  ;;  %v629_v6 = vsub.f32 %v1367_v8, %v594_v1  ;;  %v630_v26 = vsub.f32 %v1371_v10, %v594_v1 }
 0x22f   :  { %v617_v15 = vsub.s32 7, %v1303_v19  ;;  %v1472_v8 = vrot.slane %v585_v63, %v613_v12  ;;  %v637_v28 = vsub.f32 %v1398_v25, %v1464_v14  ;;  %v631_v30 = vsub.f32 %v1369_v9, %v598_v24 }
 0x230   :  { %v643_v22 = vmul.f32 1.442695, %v627_v3  ;;  %v645_v16 = vmul.f32 1.442695, %v628_v4  ;;  %v647_v7 = vmul.f32 1.442695, %v629_v6  ;;  %v632_v39 = vsub.f32 %v1376_v13, %v598_v24 }
 0x231   :  { %v649_v32 = vmul.f32 1.442695, %v630_v26  ;;  %v618_v10 = vrot.slane %v585_v63, %v617_v15  ;;  %v639_v34 = vsub.f32 %v1412_v35, %v1472_v8  ;;  %v663_v37 = vmul.f32 1.442695, %v637_v28 }
 0x232   :  { %1134 = vpow2.f32 %v643_v22  ;;  %v651_v25 = vmul.f32 1.442695, %v631_v30  ;;  %v605_v35 = vsub.s32 4, %v1303_v19  ;;  %v633_v43 = vsub.f32 %v1388_v21, %v602_v38 }
 0x233   :  { %1136 = vpow2.f32 %v645_v16  ;;  %v641_v9 = vsub.f32 %v1434_v49, %v618_v10  ;;  %v667_v41 = vmul.f32 1.442695, %v639_v34  ;;  %v653_v44 = vmul.f32 1.442695, %v632_v39 }
 0x234   :  { %1138 = vpow2.f32 %v647_v7  ;;  %v606_v47 = vrot.slane %v585_v63, %v605_v35  ;;  %v634_v48 = vsub.f32 %v1380_v17, %v602_v38  ;;  %v655_v49 = vmul.f32 1.442695, %v633_v43 }
 0x235   :  { %1140 = vpow2.f32 %v649_v32  ;;  %v671_v45 = vmul.f32 1.442695, %v641_v9  ;;  %v638_v27 = vsub.f32 %v1407_v31, %v1464_v14  ;;  %v642_v61 = vsub.f32 %v1441_v33, %v618_v10 }
 0x236   :  { %1142 = vpow2.f32 %v663_v37  ;;  %v635_v51 = vsub.f32 %v1373_v11, %v606_v47  ;;  %v657_v52 = vmul.f32 1.442695, %v634_v48  ;;  %v636_v54 = vsub.f32 %v1392_v23, %v606_v47 }
 0x237   :  { %1144 = vpow2.f32 %v651_v25  ;;  %v640_v23 = vsub.f32 %v1429_v46, %v1472_v8  ;;  %v665_v59 = vmul.f32 1.442695, %v638_v27  ;;  %v673_v0 = vmul.f32 1.442695, %v642_v61 }
 0x238   :  { %1146 = vpow2.f32 %v667_v41  ;;  %v659_v55 = vmul.f32 1.442695, %v635_v51  ;;  %v661_v57 = vmul.f32 1.442695, %v636_v54 }
 0x239   :  { %1148 = vpow2.f32 %v653_v44  ;;  %v669_v31 = vmul.f32 1.442695, %v640_v23 }
 0x23a   :  { %1150 = vpow2.f32 %v671_v45 }
 0x23b   :  { %1152 = vpow2.f32 %v655_v49 }
 0x23c   :  { %v1485_v40 = vpop.eup %1134  ;;  %1154 = vpow2.f32 %v657_v52 }
 0x23d   :  { %v1488_v42 = vpop.eup %1136  ;;  %692 = vperm.xlu1 %1120, %v1485_v40   ;;  %1156 = vpow2.f32 %v659_v55 }
 0x23e   :  { %695 = vperm.xlu0 %1121, %v1488_v42   ;;  %v1494_v13 = vpop.eup %1138  ;;  %1158 = vpow2.f32 %v661_v57 }
 0x23f   :  { %v1500_v50 = vpop.eup %1140  ;;  %1160 = vpow2.f32 %v665_v59 }
 0x240   :  { %v1503_v21 = vpop.eup %1142  ;;  %1162 = vpow2.f32 %v669_v31 }
 0x241   :  { %698 = vperm.xlu1 %1120, %v1494_v13   ;;  %v1507_v53 = vpop.eup %1144  ;;  %1164 = vpow2.f32 %v673_v0 }
 0x242   :  { %722 = vperm.xlu0 %1121, %v1503_v21   ;;  %v1510_v17 = vpop.eup %1146 }
 0x243   :  { %v1514_v56 = vpop.eup %1148 }
 0x244   :  { %v1517_v11 = vpop.eup %1150 }
 0x245   :  { %701 = vperm.xlu1 %1120, %v1500_v50   ;;  %v1522_v58 = vpop.eup %1152 }
 0x246   :  { %728 = vperm.xlu0 %1121, %v1510_v17   ;;  %v1527_v60 = vpop.eup %1154 }
 0x247   :  { %v1531_v63 = vpop.eup %1156 }
 0x248   :  { %v1534_v1 = vpop.eup %1158 }
 0x249   :  { %704 = vperm.xlu1 %1120, %v1507_v53   ;;  %v1537_v46 = vpop.eup %1160 }
 0x24a   :  { %734 = vperm.xlu0 %1121, %v1517_v11   ;;  %v1540_v3 = vpop.eup %1162 }
 0x24b   :  { %v1543_v33 = vpop.eup %1164 }
 0x24d   :  { %707 = vperm.xlu1 %1120, %v1514_v56  }
 0x251   :  { %710 = vperm.xlu1 %1120, %v1522_v58  }
 0x255   :  { %713 = vperm.xlu1 %1120, %v1527_v60  }
 0x259   :  { %716 = vperm.xlu1 %1120, %v1531_v63  }
 0x25d   :  { %719 = vperm.xlu1 %1120, %v1534_v1  }
 0x261   :  { %725 = vperm.xlu1 %1120, %v1537_v46  }
 0x265   :  { %731 = vperm.xlu1 %1120, %v1540_v3  }
 0x269   :  { %737 = vperm.xlu1 %1120, %v1543_v33  }
 0x2bc   :  { %v693_v4 = vpop.permute.xlu1 %692 }
 0x2bd   :  { %v696_v26 = vpop.permute.xlu0 %695  ;;  %v742_v39 = vrot.slane %v693_v4, %v1383_v18 }
 0x2be   :  { %v746_v38 = vrot.slane %v696_v26, %v1386_v20 }
 0x2c0   :  { %v699_v6 = vpop.permute.xlu1 %698  ;;  %v747_v52 = vsel %vm502_vm2, %v746_v38, %v742_v39 }
 0x2c1   :  { %v723_v28 = vpop.permute.xlu0 %722  ;;  %v751_v25 = vrot.slane %v699_v6, %v1383_v18 }
 0x2c2   :  { %v787_v54 = vrot.slane %v723_v28, %v1383_v18 }
 0x2c4   :  { %v702_v14 = vpop.permute.xlu1 %701 }
 0x2c5   :  { %v755_v32 = vrot.slane %v702_v14, %v1386_v20  ;;  %v729_v10 = vpop.permute.xlu0 %728 }
 0x2c6   :  { %v796_v57 = vrot.slane %v729_v10, %v1383_v18 }
 0x2c7   :  { %v756_v44 = vsel %vm502_vm2, %v755_v32, %v751_v25 }
 0x2c8   :  { %v705_v22 = vpop.permute.xlu1 %704  ;;  %v811_v23 = vsel %vm567_vm3, %v756_v44, %v747_v52 }
 0x2c9   :  { %v760_v41 = vrot.slane %v705_v22, %v1383_v18  ;;  %v735_v59 = vpop.permute.xlu0 %734 }
 0x2ca   :  { %v805_v22 = vrot.slane %v735_v59, %v1383_v18 }
 0x2cc   :  { %v708_v16 = vpop.permute.xlu1 %707 }
 0x2cd   :  { %v764_v34 = vrot.slane %v708_v16, %v1386_v20 }
 0x2cf   :  { %v765_v48 = vsel %vm502_vm2, %v764_v34, %v760_v41 }
 0x2d0   :  { %v711_v24 = vpop.permute.xlu1 %710  ;;  %v812_v31 = vsel %vm569_vm4, %v765_v48, %v811_v23 }
 0x2d1   :  { %v769_v45 = vrot.slane %v711_v24, %v1383_v18 }
 0x2d4   :  { %v714_v7 = vpop.permute.xlu1 %713 }
 0x2d5   :  { %v773_v9 = vrot.slane %v714_v7, %v1386_v20 }
 0x2d7   :  { %v774_v55 = vsel %vm502_vm2, %v773_v9, %v769_v45 }
 0x2d8   :  { %v717_v8 = vpop.permute.xlu1 %716  ;;  %v813_v4 = vsel %vm571_vm5, %v774_v55, %v812_v31 }
 0x2d9   :  { %v778_v49 = vrot.slane %v717_v8, %v1383_v18 }
 0x2dc   :  { %v720_v30 = vpop.permute.xlu1 %719 }
 0x2dd   :  { %v782_v43 = vrot.slane %v720_v30, %v1386_v20 }
 0x2df   :  { %v783_v61 = vsel %vm502_vm2, %v782_v43, %v778_v49 }
 0x2e0   :  { %v726_v37 = vpop.permute.xlu1 %725  ;;  %v814_v16 = vsel %vm573_vm6, %v783_v61, %v813_v4 }
 0x2e1   :  { %v791_v47 = vrot.slane %v726_v37, %v1386_v20 }
 0x2e3   :  { %v792_v0 = vsel %vm502_vm2, %v791_v47, %v787_v54 }
 0x2e4   :  { %v732_v51 = vpop.permute.xlu1 %731  ;;  %v815_v26 = vsel %vm575_vm7, %v792_v0, %v814_v16 }
 0x2e5   :  { %v800_v27 = vrot.slane %v732_v51, %v1386_v20 }
 0x2e7   :  { %v801_v6 = vsel %vm502_vm2, %v800_v27, %v796_v57 }
 0x2e8   :  { %v738_v14 = vpop.permute.xlu1 %737  ;;  %v816_v8 = vsel %vm577_vm8, %v801_v6, %v815_v26 }
 0x2e9   :  { %v809_v24 = vrot.slane %v738_v14, %v1386_v20 }
 0x2eb   :  { %v810_v7 = vsel %vm502_vm2, %v809_v24, %v805_v22 }
 0x2ec   :  { %v817_v28 = vsel %vm579_vm9, %v810_v7, %v816_v8 }
 0x2ed   :  { %v819_v30 = vsel %vm582_vm10, %v817_v28, 0.0 }
 0x2ee   :  { %820 = vadd.xlane.f32.xlu0 %v819_v30 }
 0x37b   :  { %v821_v32 = vpop.xlane.xlu0 %820 }
 0x37c   :  { %v842_v10 = vrot.slane %v821_v32, %v605_v35  ;;  %v826_v34 = vrot.slane %v821_v32, %v1318_v36  ;;  %v854_v37 = vrot.slane %v821_v32, %v617_v15  ;;  %v830_v38 = vrot.slane %v821_v32, %v593_v62 }
 0x37d   :  { %v834_v41 = vrot.slane %v821_v32, %v597_v5  ;;  %v838_v62 = vrot.slane %v821_v32, %v601_v29 }
 0x37e   :  { %1166 = vrcp.f32 %v842_v10 }
 0x37f   :  { %1168 = vrcp.f32 %v826_v34 }
 0x380   :  { %1170 = vrcp.f32 %v854_v37 }
 0x381   :  { %1172 = vrcp.f32 %v830_v38 }
 0x382   :  { %1174 = vrcp.f32 %v834_v41 }
 0x383   :  { %1176 = vrcp.f32 %v838_v62 }
 0x388   :  { %v1167_v39 = vpop.eup %1166 }
 0x389   :  { %v1169_v25 = vpop.eup %1168  ;;  %v876_v9 = vmul.f32 %v1167_v39, %v1531_v63 }
 0x38a   :  { %v1171_v35 = vpop.eup %1170  ;;  %v864_v36 = vmul.f32 %v1169_v25, %v1485_v40  ;;  %v865_v43 = vmul.f32 %v1169_v25, %v1488_v42  ;;  %v846_v42 = vrot.slane %v821_v32, %v609_v2 }
 0x38b   :  { %928 = vperm.xlu0 %1121, %v876_v9   ;;  %v885_v15 = vmul.f32 %v1171_v35, %v1517_v11  ;;  %v1173_v44 = vpop.eup %1172 }
 0x38c   :  { %904 = vperm.xlu1 %1120, %v864_v36   ;;  %v867_v63 = vmul.f32 %v1173_v44, %v1494_v13  ;;  %v868_v5 = vmul.f32 %v1173_v44, %v1500_v50  ;;  %v1175_v40 = vpop.eup %1174  ;;  %1178 = vrcp.f32 %v846_v42  ;;  %v850_v13 = vrot.slane %v821_v32, %v613_v12 }
 0x38d   :  { %v870_v45 = vmul.f32 %v1175_v40, %v1507_v53  ;;  %v871_v11 = vmul.f32 %v1175_v40, %v1514_v56  ;;  %v1177_v47 = vpop.eup %1176  ;;  %v877_v53 = vmul.f32 %v1167_v39, %v1534_v1  ;;  %v886_v12 = vmul.f32 %v1171_v35, %v1543_v33 }
 0x38e   :  { %v873_v29 = vmul.f32 %v1177_v47, %v1522_v58  ;;  %v874_v50 = vmul.f32 %v1177_v47, %v1527_v60  ;;  %1180 = vrcp.f32 %v850_v13 }
 0x38f   :  { %946 = vperm.xlu0 %1121, %v885_v15  }
 0x390   :  { %907 = vperm.xlu1 %1120, %v865_v43  }
 0x394   :  { %910 = vperm.xlu1 %1120, %v867_v63  }
 0x396   :  { %v1179_v48 = vpop.eup %1178 }
 0x397   :  { %v879_v2 = vmul.f32 %v1179_v48, %v1503_v21  ;;  %v880_v56 = vmul.f32 %v1179_v48, %v1537_v46 }
 0x398   :  { %913 = vperm.xlu1 %1120, %v868_v5   ;;  %v1181_v49 = vpop.eup %1180 }
 0x399   :  { %v882_v58 = vmul.f32 %v1181_v49, %v1510_v17  ;;  %v883_v19 = vmul.f32 %v1181_v49, %v1540_v3 }
 0x39c   :  { %916 = vperm.xlu1 %1120, %v870_v45  }
 0x3a0   :  { %919 = vperm.xlu1 %1120, %v871_v11  }
 0x3a4   :  { %922 = vperm.xlu1 %1120, %v873_v29  }
 0x3a8   :  { %925 = vperm.xlu1 %1120, %v874_v50  }
 0x3ac   :  { %931 = vperm.xlu1 %1120, %v877_v53  }
 0x3b0   :  { %934 = vperm.xlu1 %1120, %v879_v2  }
 0x3b4   :  { %937 = vperm.xlu1 %1120, %v880_v56  }
 0x3b8   :  { %940 = vperm.xlu1 %1120, %v882_v58  }
 0x3bc   :  { %943 = vperm.xlu1 %1120, %v883_v19  }
 0x3c0   :  { %949 = vperm.xlu1 %1120, %v886_v12  }
 0x40a   :  { %v929_v59 = vpop.permute.xlu0 %928 }
 0x40b   :  { %v905_v60 = vpop.permute.xlu1 %904  ;;  %v990_v26 = vrot.slane %v929_v59, %v1383_v18 }
 0x40c   :  { %v954_v14 = vrot.slane %v905_v60, %v1383_v18 }
 0x40e   :  { %v947_v34 = vpop.permute.xlu0 %946 }
 0x40f   :  { %v908_v1 = vpop.permute.xlu1 %907  ;;  %v1017_v15 = vrot.slane %v947_v34, %v1383_v18 }
 0x410   :  { %v958_v33 = vrot.slane %v908_v1, %v1386_v20 }
 0x412   :  { %v959_v28 = vsel %vm502_vm2, %v958_v33, %v954_v14 }
 0x413   :  { %v911_v51 = vpop.permute.xlu1 %910 }
 0x414   :  { %v963_v31 = vrot.slane %v911_v51, %v1383_v18 }
 0x417   :  { %v914_v52 = vpop.permute.xlu1 %913 }
 0x418   :  { %v967_v17 = vrot.slane %v914_v52, %v1386_v20 }
 0x41a   :  { %v968_v22 = vsel %vm502_vm2, %v967_v17, %v963_v31 }
 0x41b   :  { %v917_v54 = vpop.permute.xlu1 %916  ;;  %v1023_v37 = vsel %vm567_vm3, %v968_v22, %v959_v28 }
 0x41c   :  { %v972_v4 = vrot.slane %v917_v54, %v1383_v18 }
 0x41f   :  { %v920_v21 = vpop.permute.xlu1 %919 }
 0x420   :  { %v976_v3 = vrot.slane %v920_v21, %v1386_v20 }
 0x422   :  { %v977_v7 = vsel %vm502_vm2, %v976_v3, %v972_v4 }
 0x423   :  { %v923_v55 = vpop.permute.xlu1 %922  ;;  %v1024_v25 = vsel %vm569_vm4, %v977_v7, %v1023_v37 }
 0x424   :  { %v981_v16 = vrot.slane %v923_v55, %v1383_v18 }
 0x427   :  { %v926_v27 = vpop.permute.xlu1 %925 }
 0x428   :  { %v985_v0 = vrot.slane %v926_v27, %v1386_v20 }
 0x42a   :  { %v986_v30 = vsel %vm502_vm2, %v985_v0, %v981_v16 }
 0x42b   :  { %v932_v46 = vpop.permute.xlu1 %931  ;;  %v1025_v41 = vsel %vm571_vm5, %v986_v30, %v1024_v25 }
 0x42c   :  { %v994_v6 = vrot.slane %v932_v46, %v1386_v20 }
 0x42e   :  { %v995_v38 = vsel %vm502_vm2, %v994_v6, %v990_v26 }
 0x42f   :  { %v935_v57 = vpop.permute.xlu1 %934  ;;  %v1026_v43 = vsel %vm573_vm6, %v995_v38, %v1025_v41 }
 0x430   :  { %v999_v32 = vrot.slane %v935_v57, %v1383_v18 }
 0x433   :  { %v938_v23 = vpop.permute.xlu1 %937 }
 0x434   :  { %v1003_v24 = vrot.slane %v938_v23, %v1386_v20 }
 0x436   :  { %v1004_v9 = vsel %vm502_vm2, %v1003_v24, %v999_v32 }
 0x437   :  { %v941_v61 = vpop.permute.xlu1 %940  ;;  %v1027_v62 = vsel %vm575_vm7, %v1004_v9, %v1026_v43 }
 0x438   :  { %v1008_v39 = vrot.slane %v941_v61, %v1383_v18 }
 0x43b   :  { %v944_v8 = vpop.permute.xlu1 %943 }
 0x43c   :  { %v1012_v10 = vrot.slane %v944_v8, %v1386_v20 }
 0x43e   :  { %v1013_v35 = vsel %vm502_vm2, %v1012_v10, %v1008_v39 }
 0x43f   :  { %v950_v36 = vpop.permute.xlu1 %949  ;;  %v1028_v5 = vsel %vm577_vm8, %v1013_v35, %v1027_v62 }
 0x440   :  { %v1021_v44 = vrot.slane %v950_v36, %v1386_v20 }
 0x442   :  { %v1022_v63 = vsel %vm502_vm2, %v1021_v44, %v1017_v15 }
 0x443   :  { %v1029_v40 = vsel %vm579_vm9, %v1022_v63, %v1028_v5 }
 0x444   :  { %1031 = vst.msk [vmem:[#allocation2] sm:$0xff] %vm582_vm10, %v1029_v40 }
 0x445   :  { %1193 = shalt.err (!%p1190_p4)
}
 0x446   :  { %s1194_s8 = scalar_lea.hbm %s1660_s7, 128 }
 0x447   :  { %p1195_p5 = scmp.ne.s32.totalorder %s1660_s7, %s1194_s8  ;;  %p1198_p6 = scmp.lt.u32.totalorder %s1194_s8, %s1660_s7 }
 0x449   :  { %p1200_p7 = pnand %p1198_p6, %p1195_p5 }
 0x44b   :  { %1203 = shalt.err (!%p1200_p7)
}
 0x44c   :  { %1041 = dma.vmem_to_hbm [thread:$0]  %s1039_s6, 128, %s1660_s7, [#allocation3]  }
 0x44d   :  { %1204 = dma.done.wait [#allocation3], 128  }
 0x44e   :  { %1205 = vsyncadd [#allocation3], 4294967168 }
 0x44f   :  { %1045 = vsyncpa [#allocation3], 1 }

</bundles_post_ra>
